<compile_context>
chip_gen: v5e
topology: v5e:2x2
jax: 0.10.0
libtpu: 0.0.40
codegen_flags: <defaults>
</compile_context>

<pallas_src>
import functools

import jax
import jax.numpy as jnp
import numpy as np
from jax.experimental import pallas as pl
from jax.experimental.pallas import tpu as pltpu

LANE = 128
VMEM_WORKING_BUDGET = 12 * 1024 * 1024   # target per-step working set (bytes)
VMEM_LIMIT_BYTES = 32 * 1024 * 1024      # safe scoped VMEM limit on v5e/v6e/v7x
MAX_TILE_LANES = 8192                    # hard cap on the lane-tile size


def _focal_kernel(x_ref, t_ref, out_ref, *, alpha, gamma_int, gamma,
                  sub, tile, w_inner, hw, need_mask):
    """One (image, lane-tile) block of the focal loss.

    x_ref   : (1, C, sub, tile)  logits in source dtype (class axis leading)
    t_ref   : (1, 1, sub, tile)  integer class id per spatial position
    out_ref : (1, 1, 128)        f32 partial sum in lane 0, zeros elsewhere
    """
    j = pl.program_id(1)
    C = len(alpha)

    t = t_ref[0, 0]                                           # (sub, tile) int
    # Each class slab is a full (8,128)-dense set of vregs after the repack.
    xs = [x_ref[0, c].astype(jnp.float32) for c in range(C)]  # C x (sub, tile)

    # log-softmax pieces over the small *leading* class axis: plain VPU
    # max/add chains, no cross-lane/sublane XLU reductions, no (C,T) logp.
    m = xs[0]
    for c in range(1, C):
        m = jnp.maximum(m, xs[c])
    sum_exp = jnp.exp(xs[0] - m)
    for c in range(1, C):
        sum_exp = sum_exp + jnp.exp(xs[c] - m)

    # True-class logit and alpha via a static select chain (no one-hot matrix).
    x_t = xs[0]
    a_t = jnp.full(t.shape, alpha[0], dtype=jnp.float32)
    for c in range(1, C):
        sel = t == c
        x_t = jnp.where(sel, xs[c], x_t)
        a_t = jnp.where(sel, jnp.float32(alpha[c]), a_t)

    logpt = x_t - m - jnp.log(sum_exp)                        # (sub, tile)
    pt = jnp.exp(logpt)
    one_minus_pt = 1.0 - pt

    # Integer-gamma fast path: repeated multiplies (no EUP pow = log+exp).
    if gamma_int is not None:
        if gamma_int <= 0:
            focal = jnp.ones_like(pt)
        else:
            focal = one_minus_pt
            for _ in range(gamma_int - 1):
                focal = focal * one_minus_pt
    else:
        focal = one_minus_pt ** jnp.float32(gamma)

    loss = -focal * a_t * logpt

    if need_mask:
        # Padded flat positions (the wrapper pads with finite zeros) -> 0 loss.
        s_iota = jax.lax.broadcasted_iota(jnp.int32, (sub, tile), 0)
        l_iota = jax.lax.broadcasted_iota(jnp.int32, (sub, tile), 1)
        valid = (s_iota * w_inner + j * tile + l_iota) < hw
        loss = jnp.where(valid, loss, 0.0)

    # Lane-dense partial-sum block: tile sum in lane 0, zeros elsewhere.
    tile_sum = jnp.sum(loss, keepdims=True)                   # (1, 1)
    lane0 = jax.lax.broadcasted_iota(jnp.int32, (1, LANE), 1) == 0
    out_ref[0] = jnp.where(lane0, tile_sum, 0.0).astype(jnp.float32)


def focal_loss_pallas(x, target, alpha, gamma=2, size_average=True):
    """x: (N, C, H, W) float logits; target: (N, H, W) int class ids."""
    N, C, H, W = x.shape
    HW = H * W

    # alpha is static module config -> bake per-class scalar constants.
    a_np = np.asarray(alpha, dtype=np.float32).reshape(-1)
    if a_np.size == 1:
        a_np = np.full((C,), float(a_np[0]), dtype=np.float32)
    assert a_np.size == C, "alpha must have one entry per class"
    alpha_vals = tuple(float(v) for v in a_np)

    # Keep integer targets at their source width (HBM-byte minimization); only
    # cast non-integer inputs.
    if not jnp.issubdtype(target.dtype, jnp.integer):
        target = target.astype(jnp.int32)

    sub = 16 if x.dtype.itemsize == 2 else 8                  # sublane repack depth

    def ceil_to(v, m):
        return -(-v // m) * m

    # Pad the flat spatial length so it repacks onto `sub` sublanes; for large
    # HW also pad the lane extent to a multiple of 128 so every tile divides
    # evenly (no out-of-bounds edge blocks, mask only when padding happened).
    if HW <= sub * LANE:
        hw_pad = ceil_to(HW, sub)
    else:
        hw_pad = ceil_to(HW, sub * LANE)
    w_inner = hw_pad // sub
    need_mask = hw_pad != HW

    x3 = x.reshape(N, C, HW)
    t3 = target.reshape(N, 1, HW)
    if need_mask:
        # Rare fallback: one HBM copy; pads with finite zeros (class 0), masked
        # out of the loss inside the kernel.
        x3 = jnp.pad(x3, ((0, 0), (0, 0), (0, hw_pad - HW)))
        t3 = jnp.pad(t3, ((0, 0), (0, 0), (0, hw_pad - HW)))
    x4 = x3.reshape(N, C, sub, w_inner)                       # free repack
    t4 = t3.reshape(N, 1, sub, w_inner)

    # C- and dtype-aware lane-tile sizing: double-buffered x/t blocks plus
    # ~(C+6) live f32 (sub, tile) temporaries must fit the working-set budget.
    bytes_per_lane = (2 * sub * (C * x.dtype.itemsize + t4.dtype.itemsize)
                      + (C + 6) * sub * 4)
    cap = max(LANE, min(MAX_TILE_LANES,
                        (VMEM_WORKING_BUDGET // bytes_per_lane) // LANE * LANE))
    if w_inner <= cap:
        tile = w_inner
    else:
        tile = LANE
        for k in range(cap // LANE, 0, -1):                   # largest 128-mult divisor
            if w_inner % (k * LANE) == 0:
                tile = k * LANE
                break
    num_tiles = w_inner // tile

    # Keep the fully-parallel grid splittable across v7x's two TensorCores.
    if N == 1 and num_tiles == 1 and tile % (2 * LANE) == 0:
        tile //= 2
        num_tiles = 2

    gamma_int = None
    if isinstance(gamma, int) and not isinstance(gamma, bool):
        gamma_int = gamma
    elif isinstance(gamma, float) and float(gamma).is_integer():
        gamma_int = int(gamma)

    kernel = functools.partial(
        _focal_kernel, alpha=alpha_vals, gamma_int=gamma_int, gamma=gamma,
        sub=sub, tile=tile, w_inner=w_inner, hw=HW, need_mask=need_mask)

    partial = pl.pallas_call(
        kernel,
        out_shape=jax.ShapeDtypeStruct((N, 1, num_tiles * LANE), jnp.float32),
        grid_spec=pltpu.PrefetchScalarGridSpec(
            num_scalar_prefetch=0,
            grid=(N, num_tiles),
            in_specs=[
                pl.BlockSpec((1, C, sub, tile), lambda n, j: (n, 0, 0, j)),
                pl.BlockSpec((1, 1, sub, tile), lambda n, j: (n, 0, 0, j)),
            ],
            out_specs=pl.BlockSpec((1, 1, LANE), lambda n, j: (n, 0, j)),
        ),
        compiler_params=pltpu.CompilerParams(
            dimension_semantics=("parallel", "parallel"),
            vmem_limit_bytes=VMEM_LIMIT_BYTES),
    )(x4, t4)

    total = jnp.sum(partial)
    if size_average:
        return total / jnp.float32(N * HW)
    return total


def focal_loss_ref(x, target, alpha, gamma=2, size_average=True):
    """Pure-JAX reference mirroring the PyTorch module."""
    N, C, H, W = x.shape
    x2 = x.reshape(N, C, H * W).transpose(0, 2, 1).reshape(-1, C)
    t2 = target.reshape(-1)
    logp = jax.nn.log_softmax(x2, axis=1)
    logpt = jnp.take_along_axis(logp, t2[:, None], axis=1)[:, 0]
    pt = jnp.exp(logpt)
    at = jnp.asarray(alpha, dtype=x2.dtype)[t2]
    loss = -1.0 * (1.0 - pt) ** gamma * (logpt * at)
    return loss.mean() if size_average else loss.sum()


if __name__ == "__main__":
    key = jax.random.PRNGKey(0)
    kx, kt = jax.random.split(key)

    # class_num = 3 (module default), small spatial problem.
    N, C, H, W = 2, 3, 16, 16
    alpha = [0.1, 0.45, 0.45]
    gamma = 2

    x = jax.random.normal(kx, (N, C, H, W), dtype=jnp.float32)
    target = jax.random.randint(kt, (N, H, W), 0, C, dtype=jnp.int32)

    out = focal_loss_pallas(x, target, alpha, gamma=gamma, size_average=True)
    out = jax.block_until_ready(out)

    ref = focal_loss_ref(x, target, alpha, gamma=gamma, size_average=True)
    np.testing.assert_allclose(np.asarray(out), np.asarray(ref),
                               rtol=1e-5, atol=1e-6)
    print("KERNEL_OK")
</pallas_src>

<mosaic_0001>
module attributes {stable_mosaic.version = 11 : i64} {
  func.func @_focal_kernel(%arg0: i32, %arg1: i32, %arg2: memref<1x3x8x32xf32, #tpu.memory_space<vmem>>, %arg3: memref<1x1x8x32xi32, #tpu.memory_space<vmem>>, %arg4: memref<1x1x128xf32, #tpu.memory_space<vmem>>) attributes {dimension_semantics = [#tpu.dimension_semantics<parallel>, #tpu.dimension_semantics<parallel>], iteration_bounds = array<i64: 2, 1>, scalar_prefetch = 0 : i64, scratch_operands = 0 : i64, tpu.core_type = #tpu.core_type<tc>, window_params = [{transform_indices = @transform_0, window_bounds = array<i64: 1, 3, 8, 32>}, {transform_indices = @transform_1, window_bounds = array<i64: 1, 1, 8, 32>}, {transform_indices = @transform_2, window_bounds = array<i64: 1, 1, 128>}]} {
    %c0 = arith.constant 0 : index
    %c0_0 = arith.constant 0 : index
    %c0_1 = arith.constant 0 : index
    %c0_2 = arith.constant 0 : index
    %0 = vector.load %arg3[%c0, %c0_0, %c0_1, %c0_2] : memref<1x1x8x32xi32, #tpu.memory_space<vmem>>, vector<1x1x8x32xi32>
    %1 = vector.shape_cast %0 : vector<1x1x8x32xi32> to vector<8x32xi32>
    %c0_3 = arith.constant 0 : index
    %c0_4 = arith.constant 0 : index
    %c0_5 = arith.constant 0 : index
    %c0_6 = arith.constant 0 : index
    %2 = vector.load %arg2[%c0_3, %c0_4, %c0_5, %c0_6] : memref<1x3x8x32xf32, #tpu.memory_space<vmem>>, vector<1x1x8x32xf32>
    %3 = vector.shape_cast %2 : vector<1x1x8x32xf32> to vector<8x32xf32>
    %c0_7 = arith.constant 0 : index
    %c1 = arith.constant 1 : index
    %c0_8 = arith.constant 0 : index
    %c0_9 = arith.constant 0 : index
    %4 = vector.load %arg2[%c0_7, %c1, %c0_8, %c0_9] : memref<1x3x8x32xf32, #tpu.memory_space<vmem>>, vector<1x1x8x32xf32>
    %5 = vector.shape_cast %4 : vector<1x1x8x32xf32> to vector<8x32xf32>
    %c0_10 = arith.constant 0 : index
    %c2 = arith.constant 2 : index
    %c0_11 = arith.constant 0 : index
    %c0_12 = arith.constant 0 : index
    %6 = vector.load %arg2[%c0_10, %c2, %c0_11, %c0_12] : memref<1x3x8x32xf32, #tpu.memory_space<vmem>>, vector<1x1x8x32xf32>
    %7 = vector.shape_cast %6 : vector<1x1x8x32xf32> to vector<8x32xf32>
    %8 = arith.maximumf %3, %5 : vector<8x32xf32>
    %9 = arith.maximumf %8, %7 : vector<8x32xf32>
    %10 = arith.subf %3, %9 : vector<8x32xf32>
    %11 = math.exp %10 : vector<8x32xf32>
    %12 = arith.subf %5, %9 : vector<8x32xf32>
    %13 = math.exp %12 : vector<8x32xf32>
    %14 = arith.addf %11, %13 : vector<8x32xf32>
    %15 = arith.subf %7, %9 : vector<8x32xf32>
    %16 = math.exp %15 : vector<8x32xf32>
    %17 = arith.addf %14, %16 : vector<8x32xf32>
    %cst = arith.constant 1.000000e-01 : f32
    %18 = vector.broadcast %cst : f32 to vector<8x32xf32>
    %c1_i32 = arith.constant 1 : i32
    %19 = vector.broadcast %c1_i32 : i32 to vector<8x32xi32>
    %20 = arith.cmpi eq, %1, %19 : vector<8x32xi32>
    %21 = arith.select %20, %5, %3 : vector<8x32xi1>, vector<8x32xf32>
    %cst_13 = arith.constant 4.500000e-01 : f32
    %22 = vector.broadcast %cst_13 : f32 to vector<8x32xf32>
    %23 = arith.select %20, %22, %18 : vector<8x32xi1>, vector<8x32xf32>
    %c2_i32 = arith.constant 2 : i32
    %24 = vector.broadcast %c2_i32 : i32 to vector<8x32xi32>
    %25 = arith.cmpi eq, %1, %24 : vector<8x32xi32>
    %26 = arith.select %25, %7, %21 : vector<8x32xi1>, vector<8x32xf32>
    %cst_14 = arith.constant 4.500000e-01 : f32
    %27 = vector.broadcast %cst_14 : f32 to vector<8x32xf32>
    %28 = arith.select %25, %27, %23 : vector<8x32xi1>, vector<8x32xf32>
    %29 = arith.subf %26, %9 : vector<8x32xf32>
    %30 = math.log %17 : vector<8x32xf32>
    %31 = arith.subf %29, %30 : vector<8x32xf32>
    %32 = math.exp %31 : vector<8x32xf32>
    %cst_15 = arith.constant 1.000000e+00 : f32
    %33 = vector.broadcast %cst_15 : f32 to vector<8x32xf32>
    %34 = arith.subf %33, %32 : vector<8x32xf32>
    %35 = arith.mulf %34, %34 : vector<8x32xf32>
    %cst_16 = arith.constant 0.000000e+00 : f32
    %36 = vector.broadcast %cst_16 : f32 to vector<8x32xf32>
    %37 = arith.subf %36, %35 : vector<8x32xf32>
    %38 = arith.mulf %37, %28 : vector<8x32xf32>
    %39 = arith.mulf %38, %31 : vector<8x32xf32>
    %40 = vector.shape_cast %39 : vector<8x32xf32> to vector<1x8x32xf32>
    %cst_17 = arith.constant dense<0.000000e+00> : vector<1xf32>
    %41 = vector.multi_reduction <add>, %40, %cst_17 [1, 2] : vector<1x8x32xf32> to vector<1xf32>
    %42 = vector.shape_cast %41 : vector<1xf32> to vector<1x1x1xf32>
    %43 = vector.extract %42[0, 0, 0] : f32 from vector<1x1x1xf32>
    %44 = vector.broadcast %43 : f32 to vector<1x1xf32>
    %45 = tpu.iota {dimensions = array<i32: 1>} : vector<1x128xi32>
    %c0_i32 = arith.constant 0 : i32
    %46 = vector.broadcast %c0_i32 : i32 to vector<1x128xi32>
    %47 = arith.cmpi eq, %45, %46 : vector<1x128xi32>
    %cst_18 = arith.constant 0.000000e+00 : f32
    %48 = vector.shape_cast %44 : vector<1x1xf32> to vector<1x1xf32>
    %49 = vector.broadcast %48 : vector<1x1xf32> to vector<1x128xf32>
    %50 = vector.broadcast %cst_18 : f32 to vector<1x128xf32>
    %51 = arith.select %47, %49, %50 : vector<1x128xi1>, vector<1x128xf32>
    %c0_19 = arith.constant 0 : index
    %c0_20 = arith.constant 0 : index
    %c0_21 = arith.constant 0 : index
    %52 = vector.load %arg4[%c0_19, %c0_20, %c0_21] : memref<1x1x128xf32, #tpu.memory_space<vmem>>, vector<1x1x128xf32>
    %53 = vector.shape_cast %52 : vector<1x1x128xf32> to vector<1x128xf32>
    %54 = vector.shape_cast %51 : vector<1x128xf32> to vector<1x1x128xf32>
    tpu.vector_store %arg4[%c0_19, %c0_20, %c0_21], %54 {strides = array<i32>} : memref<1x1x128xf32, #tpu.memory_space<vmem>>, vector<1x1x128xf32>,
    return
  }
  func.func @transform_0(%arg0: i32, %arg1: i32) -> (i32, i32, i32, i32) {
    %c0_i32 = arith.constant 0 : i32
    %c0_i32_0 = arith.constant 0 : i32
    %c0_i32_1 = arith.constant 0 : i32
    return %arg0, %c0_i32, %c0_i32_0, %arg1 : i32, i32, i32, i32
  }
  func.func @transform_1(%arg0: i32, %arg1: i32) -> (i32, i32, i32, i32) {
    %c0_i32 = arith.constant 0 : i32
    %c0_i32_0 = arith.constant 0 : i32
    %c0_i32_1 = arith.constant 0 : i32
    return %arg0, %c0_i32, %c0_i32_0, %arg1 : i32, i32, i32, i32
  }
  func.func @transform_2(%arg0: i32, %arg1: i32) -> (i32, i32, i32) {
    %c0_i32 = arith.constant 0 : i32
    %c0_i32_0 = arith.constant 0 : i32
    return %arg0, %c0_i32, %arg1 : i32, i32, i32
  }
}

</mosaic_0001>

<bundles_post_ra>
// kernel: tpu_custom_call.1
= control target key start
LH: loop header
LB: loop body
LE: loop exit
PB: predicated region body
PF: predicated region fallthrough
CT: control target
= control target key end

     0   :  { %7 = vsyncpa [#allocation3], 0  ;;  %s793_s0 = inlined_call_operand.hbm [shape: f32[2,3,8,32], index: 0, kind: input, shape index: {}]   ;;  %s794_s1 = inlined_call_operand.hbm [shape: s32[2,1,8,32], index: 1, kind: input, shape index: {}]   ;;  %s795_s2 = inlined_call_operand.hbm [shape: f32[2,1,128], index: 2, kind: output, shape index: {}]  }
   0x1   :  { %9 = vsyncpa [#allocation3 + $0x1], 0 }
   0x2   :  { %10 = vsyncpa [#allocation6], 0 }
   0x3   :  { %12 = vsyncpa [#allocation6 + $0x1], 0 }
   0x4   :  { %13 = vsyncpa [#allocation4], 0 }
   0x5   :  { %15 = vsyncpa [#allocation4 + $0x1], 0  ;;  %s654_s9 = smov 0   ;;  %s656_s10 = smov 0  }
   0x6   :  { %s658_s11 = smov 0   ;;  %s660_s12 = smov 0  }
   0x7   :  { %s662_s13 = smov 0   ;;  %s664_s14 = smov 0  }
   0x8 LB: > { %s390_s15 = sadd.s32 4294967295, %s634_s14   ;;  %s391_s16 = sadd.s32 4294967294, %s634_s14   ;;  %s634_s14 = sphi %s664_s14, %s21_s14   ;;  %s630_s13 = sphi %s662_s13, %s805_s13   ;;  %s626_s12 = sphi %s660_s12, %s804_s12   ;;  %s622_s11 = sphi %s658_s11, %s803_s11   ;;  %s618_s10 = sphi %s656_s10, %s802_s10   ;;  %s614_s9 = sphi %s654_s9, %s801_s9  }
   0x9   : > { %s33_s17 = sadd.s32 1, %s630_s13  ;;  %s42_s18 = sadd.s32 1, %s622_s11 }
   0xa   : > { %p35_p0 = scmp.ge.s32.totalorder %s33_s17, 2  ;;  %p49_p1 = scmp.ne.s32.totalorder %s622_s11, %s618_s10 }
   0xb   : > { %p50_p2 = scmp.eq.s32.totalorder %s634_s14, 0  ;;  %p55_p3 = scmp.ne.s32.totalorder %s618_s10, %s614_s9 }
   0xc   : > { %s807_s17 = smov (%p35_p0, %s33_s17), 0  ;;  %p56_p5 = scmp.eq.s32.totalorder %s390_s15, 0 }
   0xd   : > { %p695_p4 = por %p50_p2, %p49_p1  ;;  %s37_s20 = ssub.s32 %s630_s13, %s807_s17 }
   0xe   : > { %p109_p6 = scmp.eq.s32.totalorder %s390_s15, 1  ;;  %p40_p7 = scmp.eq.s32.totalorder %s37_s20, 0 }
   0xf   : > { %p701_p8 = por %p56_p5, %p55_p3  ;;  %p115_p10 = scmp.eq.s32.totalorder %s391_s16, 1 }
  0x10   : > { %p705_p9 = por %p109_p6, %p49_p1  ;;  %p393_p12 = scmp.ge.s32.totalorder %s634_s14, 2 }
  0x11   : > { %s710_s23 = scalar_select %p40_p7, %s622_s11, %s42_s18  }
  0x12   : > { %p712_p11 = por %p115_p10, %p55_p3  ;;  %p425_p13 = scmp.lt.s32.totalorder %s634_s14, 2 }
  0x13   : > { %s135_s25 = sand.u32 1, %s622_s11   ;;  %s404_s27 = smul.u32 24, %s630_s13 }
  0x14   : > { %s403_s26 = smul.u32 24, %s135_s25  ;;  %p722_p0 = pnand %p425_p13, %p695_p4 }
  0x15   : > { %s145_s3 = scalar_lea.hbm %s793_s0, %s404_s27  ;;  %p397_p1 = scmp.ge.s32.totalorder %s634_s14, 1 }
  0x16   : > { %s139_s4 = scalar_lea.vmem [#allocation2], %s403_s26  ;;  %s146_s6 = sshll.u32 %s145_s3, 4  ;;  %s147_s6 = int_to_ptr.hbm [resolvable:$true] %s146_s6 }
  0x17   : > { %s148_s5 = sshll.u32 %s139_s4, 4  ;;  %s136_s7 = scalar_lea.sflag [#allocation3], %s135_s25  ;;  %s149_s5 = int_to_ptr.vmem [resolvable:$true] %s148_s5 }
  0x18   : > { %s636_s8 = smov 128   ;;  %s637_s15 = smov 8  }
  0x19   : > { %417 = dma.hbm_to_vmem [thread:$0]  (!%p722_p0), %s147_s6, 384, %s149_s5, %s136_s7, %s636_s8, %s636_s8, %s637_s15  }
  0x1a   : > { %p176_p2 = scmp.lt.s32.totalorder %s634_s14, 3  ;;  %s395_s16 = sshll.u32 %s135_s25, 3 }
  0x1b   : > { %s396_s18 = sshll.u32 %s630_s13, 3  ;;  %s162_s26 = scalar_lea.vmem [#allocation5], %s395_s16 }
  0x1c   : > { %p177_p3 = pnand %p397_p1, %p176_p2  ;;  %s167_s27 = scalar_lea.hbm %s794_s1, %s396_s18 }
  0x1d   : > { %s171_s29 = sshll.u32 %s162_s26, 4  ;;  %s169_s30 = sshll.u32 %s167_s27, 4  ;;  %s172_s29 = int_to_ptr.vmem [resolvable:$true] %s171_s29  ;;  %s170_s30 = int_to_ptr.hbm [resolvable:$true] %s169_s30 }
  0x1e   : > { %s159_s3 = scalar_lea.sflag [#allocation6], %s135_s25  ;;  %180 = sbr.rel (%p177_p3) target bundleno = 275 (0x113), region = 28 }
  0x1f   : > { %420 = dma.hbm_to_vmem [thread:$0]  (!%p722_p0), %s170_s30, 128, %s172_s29, %s159_s3  }
  0x20   : > { %s740_s4 = sand.u32 (!%p177_p3), 1, %s618_s10  }
  0x21   : > { %s405_s5 = smul.u32 (!%p177_p3), 24, %s740_s4  ;;  %s183_s6 = scalar_lea.sflag (!%p177_p3), [#allocation3], %s740_s4 }
  0x23   : > { %s186_s7 = scalar_lea.vmem [#allocation2], %s405_s5 }
  0x24   : > { %601 = dma.done.wait (%p701_p8), %s183_s6, 384  }
  0x25   : > { %603 = vsyncadd (%p701_p8), %s183_s6, 4294966912  ;;  %s398_s25 = sshll.u32 %s740_s4, 3  ;;  %s193_s28 = scalar_lea.sflag [#allocation6], %s740_s4 }
  0x26   : > { %s196_s8 = scalar_lea.vmem [#allocation5], %s398_s25 }
  0x27   : > { %605 = dma.done.wait (%p701_p8), %s193_s28, 128  }
  0x28   : > { %607 = vsyncadd (%p701_p8), %s193_s28, 4294967168  ;;  %v223_v0 = vld [vmem:[%s186_s7] sm:$0xff]  ;;  %v399_v1 = vld [vmem:[%s186_s7 + $0x8] sm:$0xff]  ;;  %v638_v25 = vmov 0.1   ;;  %vm258_vm2 = vcmask 261120   ;;  %v269_v41 = vlaneseq  ;;  %s285_s16 = scalar_lea.hbm %s795_s2, %s626_s12 }
  0x29   : > { %v400_v2 = vld [vmem:[%s186_s7 + $0x10] sm:$0xff]  ;;  %v228_v3 = vmax.f32 %v223_v0, %v399_v1  ;;  %s221_s18 = scalar_lea.vmem [#allocation7], %s740_s4  ;;  %s289_s20 = sshll.u32 %s285_s16, 4  ;;  %s290_s20 = int_to_ptr.hbm [resolvable:$true] %s289_s20 }
  0x2a   : > { %v222_v11 = vld [vmem:[%s196_s8] sm:$0xff]  ;;  %v270_v42 = vand.u32 127, %v269_v41  ;;  %s287_s19 = sshll.u32 %s221_s18, 4  ;;  %s276_s26 = scalar_lea.sflag [#allocation4], %s740_s4  ;;  %s288_s19 = int_to_ptr.vmem [resolvable:$true] %s287_s19 }
  0x2b   : > { %v229_v4 = vmax.f32 %v228_v3, %v400_v2  ;;  %vm241_vm0 = vcmp.eq.s32.totalorder %v222_v11, 1  ;;  %vm244_vm1 = vcmp.eq.s32.totalorder %v222_v11, 2  ;;  %s562_s29 = sshra.s32 %s290_s20, 4  ;;  %s568_s5 = scalar_lea.hbm %s795_s2, 2  ;;  %s563_s29 = int_to_ptr.hbm [resolvable:$true] %s562_s29 }
  0x2c   : > { %v242_v17 = vsel %vm241_vm0, %v399_v1, %v223_v0  ;;  %v243_v26 = vsel %vm241_vm0, 0.45, %v638_v25  ;;  %vm271_vm3 = vcmp.eq.s32.totalorder %v270_v42, 0  ;;  %s564_s30 = scalar_lea.hbm %s563_s29, 1  ;;  %p569_p7 = scmp.lt.s32.totalorder %s563_s29, %s795_s2 }
  0x2d   : > { %v230_v5 = vsub.f32 %v223_v0, %v229_v4  ;;  %v233_v6 = vsub.f32 %v399_v1, %v229_v4  ;;  %v237_v7 = vsub.f32 %v400_v2, %v229_v4  ;;  %v245_v18 = vsel %vm244_vm1, %v400_v2, %v242_v17  ;;  %p565_p4 = scmp.ne.s32.totalorder %s563_s29, %s564_s30  ;;  %p570_p8 = scmp.lt.s32.totalorder %s568_s5, %s564_s30 }
  0x2e   : > { %v247_v19 = vsub.f32 %v245_v18, %v229_v4  ;;  %v246_v29 = vsel %vm244_vm1, 0.45, %v243_v26 }
  0x2f   : > { %v231_v8 = vmul.f32 1.442695, %v230_v5  ;;  %v234_v9 = vmul.f32 1.442695, %v233_v6  ;;  %v238_v10 = vmul.f32 1.442695, %v237_v7  ;;  %p566_p5 = pnand %p565_p4, %p705_p9  ;;  %p571_p10 = por %p570_p8, %p569_p7 }
  0x31   : > { %478 = vpow2.f32 %v231_v8  ;;  %p567_p6 = pneg %p566_p5 }
  0x32   : > { %480 = vpow2.f32 %v234_v9 }
  0x33   : > { %482 = vpow2.f32 %v238_v10  ;;  %p572_p13 = pnand %p571_p10, %p567_p6 }
  0x37   : > { %v479_v12 = vpop.eup %478 }
  0x38   : > { %v481_v13 = vpop.eup %480 }
  0x39   : > { %v483_v14 = vpop.eup %482  ;;  %v236_v15 = vadd.f32 %v481_v13, %v479_v12 }
  0x3b   : > { %v240_v16 = vadd.f32 %v483_v14, %v236_v15 }
  0x3d   : > { %484 = vlog2.f32 %v240_v16 }
  0x43   : > { %v485_v20 = vpop.eup %484 }
  0x44   : > { %v249_v21 = vmul.f32 0.6931472, %v485_v20 }
  0x46   : > { %v250_v22 = vsub.f32 %v247_v19, %v249_v21 }
  0x48   : > { %v251_v23 = vmul.f32 1.442695, %v250_v22 }
  0x4a   : > { %486 = vpow2.f32 %v251_v23 }
  0x50   : > { %v487_v24 = vpop.eup %486 }
  0x51   : > { %v253_v27 = vsub.f32 1.0, %v487_v24 }
  0x53   : > { %v254_v28 = vmul.f32 %v253_v27, %v253_v27 }
  0x55   : > { %v255_v30 = vsub.f32 0.0, %v254_v28 }
  0x57   : > { %v256_v31 = vmul.f32 %v255_v30, %v246_v29 }
  0x59   : > { %v257_v32 = vmul.f32 %v256_v31, %v250_v22 }
  0x5b   : > { %v259_v33 = vsel %vm258_vm2, %v257_v32, 0.0 }
  0x5c   : > { %260 = vadd.xlane.f32.xlu0 %v259_v33 }
  0xcf   : > { %v261_v34 = vpop.xlane.xlu0 %260 }
  0xd0   : > { %v262_v35 = vrot.slane %v261_v34, 4 }
  0xd2   : > { %v263_v36 = vadd.f32 %v262_v35, %v261_v34 }
  0xd4   : > { %v264_v37 = vrot.slane %v263_v36, 2 }
  0xd6   : > { %v265_v38 = vadd.f32 %v264_v37, %v263_v36 }
  0xd8   : > { %v266_v39 = vrot.slane %v265_v38, 1 }
  0xda   : > { %v267_v40 = vadd.f32 %v266_v39, %v265_v38 }
  0xdc   : > { %406 = vpush %v267_v40 }
 0x10d   : > { %s407_s27 = spop %406 }
 0x10e   : > { %v272_v43 = vstv %s407_s27 }
 0x10f   : > { %v273_v44 = vsel %vm271_vm3, %v272_v43, 0.0 }
 0x110   : > { %274 = vst [vmem:[%s221_s18] sm:$0x1] %v273_v44 }
 0x111   : > { %575 = shalt.err (!%p572_p13)
}
 0x112   : > { %412 = dma.vmem_to_hbm [thread:$0]  (%p705_p9), %s288_s19, 16, %s290_s20, %s276_s26  }
 0x113 PF: > { %s301_s4 = sand.u32 1, %s614_s9   ;;  %p422_p0 = pnand %p393_p12, %p712_p11 }
 0x114   : > { %s302_s25 = scalar_lea.sflag [#allocation4], %s301_s4 }
 0x115   : > { %p423_p1 = pneg %p422_p0 }
 0x117   : > { %609 = dma.done.wait (%p423_p1), %s302_s25, 16  }
 0x118   : > { %611 = vsyncadd (%p423_p1), %s302_s25, 4294967280  ;;  %s21_s14 = sadd.s32 1, %s634_s14   ;;  %s801_s9 = smov %s618_s10 }
 0x119   : > { %p18_p2 = scmp.ge.s32.totalorder %s21_s14, 4   ;;  %s802_s10 = smov %s622_s11 }
 0x11a   : > { %s803_s11 = smov %s710_s23  ;;  %s804_s12 = smov %s630_s13 }
 0x11b   : > { %s805_s13 = smov %s807_s17  ;;  %20 = sbr.rel (!%p18_p2) target bundleno = 8 (0x8), region = 88 }
 0x120   :  { %307 = vsyncpa [#allocation3], 1 }
 0x121   :  { %309 = vsyncpa [#allocation3 + $0x1], 1 }
 0x122   :  { %310 = vsyncpa [#allocation6], 1 }
 0x123   :  { %312 = vsyncpa [#allocation6 + $0x1], 1 }
 0x124   :  { %313 = vsyncpa [#allocation4], 1 }
 0x125   :  { %315 = vsyncpa [#allocation4 + $0x1], 1 }

</bundles_post_ra>
